<compile_context>
chip_gen: v6e
topology: v6e:2x2x1
jax: 0.10.0
libtpu: 0.0.40
codegen_flags: <defaults>
</compile_context>

<pallas_src>
import functools

import jax
import jax.numpy as jnp
import numpy as np
from jax.experimental import pallas as pl
from jax.experimental.pallas import tpu as pltpu


def _round_up(v, m):
    return (v + m - 1) // m * m


def _multiscale_conv_kernel(k, C_in, L, L_out, B_blk, x_ref, w_ref, b_ref,
                            out_ref):
    """One batch block; all convs fused into k accumulating matmuls / element.

    x_ref  : (B_blk, C_in, L)         input slab for this grid step
    w_ref  : (total_C, k*C_in)        all conv weights, fused host-side
    b_ref  : (total_C, 1) f32         all biases, fused host-side
    out_ref: (B_blk, total_C, L_out)  written straight into (N, total_C, L_out)
    """
    total_C = w_ref.shape[0]
    bias = b_ref[...]                                       # (total_C, 1) f32

    def body(n, carry):
        xn = x_ref[n]                                       # (C_in, L)
        # Bias-initialized f32 accumulator (saves a separate add per element).
        acc = jnp.broadcast_to(bias, (total_C, L_out))
        for j in range(k):                                  # tiny static tap loop
            if j == 0:
                xj = xn[:, :L_out]                          # aligned slice
            elif L % 128 == 0:
                # Lane-aligned input: do the tap shift on the XLU (roll), then
                # take an aligned [0:L_out) slice.
                xj = pltpu.roll(xn, shift=L - j, axis=-1)[:, :L_out]
            else:
                xj = xn[:, j:j + L_out]                     # small static shift
            wj = w_ref[:, j * C_in:(j + 1) * C_in]          # (total_C, C_in)
            acc = acc + jnp.dot(wj, xj,
                                preferred_element_type=jnp.float32)
        out_ref[n] = acc.astype(out_ref.dtype)
        return carry

    jax.lax.fori_loop(0, B_blk, body, 0, unroll=(B_blk <= 8))


def multiscale_cnn_forward(x, weights, biases):
    """x: (N, C_in, L); weights[i]: (C_out, C_in, k_i); biases[i]: (C_out,)."""
    N, C_in, L = (int(d) for d in x.shape)
    num_convs = len(weights)
    C_out = int(weights[0].shape[0])
    kernel_sizes = tuple(int(w.shape[2]) for w in weights)
    L_outs = {L - ks + 1 for ks in kernel_sizes}
    assert len(L_outs) == 1, (
        "torch.cat(dim=1) in the reference forward requires all conv output "
        "lengths to match (equal kernel sizes)")
    L_out = L_outs.pop()
    k = kernel_sizes[0]
    total_C = num_convs * C_out

    # ---- host-side weight/bias fusion (layout plumbing, done once) ----------
    #   W_all[i*C_out + o, j*C_in + c] = weights[i][o, c, j]
    w_flat = [jnp.transpose(w, (0, 2, 1)).reshape(C_out, k * C_in)
              for w in weights]
    w_all = jnp.concatenate(w_flat, axis=0).astype(x.dtype)   # (total_C, k*C_in)
    b_all = jnp.concatenate([b.reshape(C_out) for b in biases], axis=0)
    b_all = b_all.astype(jnp.float32).reshape(total_C, 1)     # (total_C, 1)

    # ---- batch-block size from a VMEM byte budget ----------------------------
    itemsize = jnp.dtype(x.dtype).itemsize
    x_row = _round_up(C_in, 8) * _round_up(L, 128) * itemsize        # padded tile
    out_row = _round_up(total_C, 8) * _round_up(L_out, 128) * itemsize
    per_batch = x_row + out_row
    budget = 8 << 20                       # ~8 MiB of (x + out) tiles per step
    B_blk = max(1, min(N, budget // max(per_batch, 1)))
    if N >= 2:                             # keep >= 2 grid steps: both v7x TCs
        B_blk = min(B_blk, -(-N // 2))
    B_blk = int(B_blk)
    G = -(-N // B_blk)
    N_pad = G * B_blk
    if N_pad != N:
        x = jnp.pad(x, ((0, N_pad - N), (0, 0), (0, 0)))

    # Explicit VMEM limit: double-buffered x/out blocks + resident weights +
    # headroom, clamped so the same tiling also fits v7x (64 MiB physical).
    w_bytes = _round_up(total_C, 8) * _round_up(k * C_in, 128) * itemsize
    b_bytes = _round_up(total_C, 8) * 128 * 4
    vmem_limit = 2 * B_blk * per_batch + 2 * (w_bytes + b_bytes) + (4 << 20)
    vmem_limit = int(min(max(vmem_limit, 16 << 20), 48 << 20))

    kernel = functools.partial(_multiscale_conv_kernel, k, C_in, L, L_out,
                               B_blk)

    out = pl.pallas_call(
        kernel,
        out_shape=jax.ShapeDtypeStruct((N_pad, total_C, L_out), x.dtype),
        grid_spec=pltpu.PrefetchScalarGridSpec(
            num_scalar_prefetch=0,
            grid=(G,),
            in_specs=[
                pl.BlockSpec((B_blk, C_in, L), lambda g: (g, 0, 0)),
                # Grid-invariant fused weights / bias: constant index_map,
                # stays VMEM-resident (no per-step re-DMA).
                pl.BlockSpec((total_C, k * C_in), lambda g: (0, 0)),
                pl.BlockSpec((total_C, 1), lambda g: (0, 0)),
            ],
            # Direct (B_blk, total_C, L_out) blocks into the final layout: no
            # wrapper-side un-fold / transpose, the output hits HBM exactly once.
            # TODO(synk): when L_out < 128 the vreg->VMEM stores are masked; a
            # batch-folded (total_C, N*L_out) public layout would make them
            # lane-dense, but that changes the module's output layout, so it is
            # left to downstream fusion.
            out_specs=pl.BlockSpec((B_blk, total_C, L_out),
                                   lambda g: (g, 0, 0)),
        ),
        compiler_params=pltpu.CompilerParams(
            dimension_semantics=("parallel",),
            vmem_limit_bytes=vmem_limit),
    )(x, w_all, b_all)

    return out[:N]


def _reference_forward(x, weights, biases):
    """Pure-JAX reference (same math as torch Conv1d + cat)."""
    outs = []
    N, C_in, L = x.shape
    for w, b in zip(weights, biases):
        C_out, _, k = w.shape
        L_out = L - k + 1
        acc = jnp.zeros((N, C_out, L_out), jnp.float32)
        for j in range(k):
            # (N, C_in, L_out) x (C_out, C_in) -> (N, C_out, L_out)
            acc = acc + jnp.einsum('ncl,oc->nol', x[:, :, j:j + L_out],
                                   w[:, :, j])
        outs.append(acc + b[None, :, None])
    return jnp.concatenate(outs, axis=1)


if __name__ == "__main__":
    # config: input_channels=4, output_channels=8, kernel_sizes=[3, 3, 3]
    # (equal kernel sizes so torch.cat(dim=1) in the original forward is valid)
    N, C_in, L = 2, 4, 16
    C_out = 8
    kernel_sizes = [3, 3, 3]

    key = jax.random.PRNGKey(0)
    kx, *kws = jax.random.split(key, 1 + 2 * len(kernel_sizes))
    x = jax.random.normal(kx, (N, C_in, L), dtype=jnp.float32)

    weights, biases = [], []
    for i, ks in enumerate(kernel_sizes):
        kw, kb = kws[2 * i], kws[2 * i + 1]
        # deterministic init (PyTorch-style uniform bound 1/sqrt(C_in * k))
        bound = 1.0 / np.sqrt(C_in * ks)
        weights.append(jax.random.uniform(kw, (C_out, C_in, ks),
                                          minval=-bound, maxval=bound,
                                          dtype=jnp.float32))
        biases.append(jax.random.uniform(kb, (C_out,),
                                         minval=-bound, maxval=bound,
                                         dtype=jnp.float32))

    out = multiscale_cnn_forward(x, weights, biases)
    out = jax.block_until_ready(out)

    ref = _reference_forward(x, weights, biases)
    np.testing.assert_allclose(np.asarray(out), np.asarray(ref),
                               rtol=1e-5, atol=1e-5)

    print("KERNEL_OK")
</pallas_src>

<mosaic_0001>
module attributes {stable_mosaic.version = 11 : i64} {
  func.func @_multiscale_conv_kernel(%arg0: i32, %arg1: memref<1x4x16xf32, #tpu.memory_space<vmem>>, %arg2: memref<24x12xf32, #tpu.memory_space<vmem>>, %arg3: memref<24x1xf32, #tpu.memory_space<vmem>>, %arg4: memref<1x24x14xf32, #tpu.memory_space<vmem>>) attributes {dimension_semantics = [#tpu.dimension_semantics<parallel>], iteration_bounds = array<i64: 2>, scalar_prefetch = 0 : i64, scratch_operands = 0 : i64, tpu.core_type = #tpu.core_type<tc>, window_params = [{transform_indices = @transform_0, window_bounds = array<i64: 1, 4, 16>}, {pipeline_mode = #tpu.pipeline_mode<synchronous>, transform_indices = @transform_1, window_bounds = array<i64: 24, 12>}, {pipeline_mode = #tpu.pipeline_mode<synchronous>, transform_indices = @transform_2, window_bounds = array<i64: 24, 1>}, {transform_indices = @transform_3, window_bounds = array<i64: 1, 24, 14>}]} {
    %c0 = arith.constant 0 : index
    %c0_0 = arith.constant 0 : index
    %0 = vector.load %arg3[%c0, %c0_0] : memref<24x1xf32, #tpu.memory_space<vmem>>, vector<24x1xf32>
    %c0_i32 = arith.constant 0 : i32
    %1 = arith.index_cast %c0_i32 : i32 to index
    %c0_1 = arith.constant 0 : index
    %c0_2 = arith.constant 0 : index
    %2 = vector.load %arg1[%1, %c0_1, %c0_2] : memref<1x4x16xf32, #tpu.memory_space<vmem>>, vector<1x4x16xf32>
    %3 = vector.shape_cast %2 : vector<1x4x16xf32> to vector<4x16xf32>
    %4 = vector.shape_cast %0 : vector<24x1xf32> to vector<24x1xf32>
    %5 = vector.broadcast %4 : vector<24x1xf32> to vector<24x14xf32>
    %6 = vector.extract_strided_slice %3 {offsets = [0, 0], sizes = [4, 14], strides = [1, 1]} : vector<4x16xf32> to vector<4x14xf32>
    %c0_3 = arith.constant 0 : index
    %c0_4 = arith.constant 0 : index
    %7 = vector.load %arg2[%c0_3, %c0_4] : memref<24x12xf32, #tpu.memory_space<vmem>>, vector<24x4xf32>
    %cst = arith.constant dense<0.000000e+00> : vector<24x14xf32>
    %8 = tpu.matmul %7, %6, %cst {dimension_numbers = #tpu.dot_dimension_numbers<[1], [0], [0], [1], [0, 0, 1, 1], [], []>} : vector<24x4xf32>, vector<4x14xf32>, vector<24x14xf32> -> vector<24x14xf32>
    %9 = arith.addf %5, %8 : vector<24x14xf32>
    %10 = vector.extract_strided_slice %3 {offsets = [0, 1], sizes = [4, 14], strides = [1, 1]} : vector<4x16xf32> to vector<4x14xf32>
    %c0_5 = arith.constant 0 : index
    %c4 = arith.constant 4 : index
    %11 = vector.load %arg2[%c0_5, %c4] : memref<24x12xf32, #tpu.memory_space<vmem>>, vector<24x4xf32>
    %cst_6 = arith.constant dense<0.000000e+00> : vector<24x14xf32>
    %12 = tpu.matmul %11, %10, %cst_6 {dimension_numbers = #tpu.dot_dimension_numbers<[1], [0], [0], [1], [0, 0, 1, 1], [], []>} : vector<24x4xf32>, vector<4x14xf32>, vector<24x14xf32> -> vector<24x14xf32>
    %13 = arith.addf %9, %12 : vector<24x14xf32>
    %14 = vector.extract_strided_slice %3 {offsets = [0, 2], sizes = [4, 14], strides = [1, 1]} : vector<4x16xf32> to vector<4x14xf32>
    %c0_7 = arith.constant 0 : index
    %c8 = arith.constant 8 : index
    %15 = vector.load %arg2[%c0_7, %c8] : memref<24x12xf32, #tpu.memory_space<vmem>>, vector<24x4xf32>
    %cst_8 = arith.constant dense<0.000000e+00> : vector<24x14xf32>
    %16 = tpu.matmul %15, %14, %cst_8 {dimension_numbers = #tpu.dot_dimension_numbers<[1], [0], [0], [1], [0, 0, 1, 1], [], []>} : vector<24x4xf32>, vector<4x14xf32>, vector<24x14xf32> -> vector<24x14xf32>
    %17 = arith.addf %13, %16 : vector<24x14xf32>
    %18 = arith.index_cast %c0_i32 : i32 to index
    %c0_9 = arith.constant 0 : index
    %c0_10 = arith.constant 0 : index
    %19 = vector.load %arg4[%18, %c0_9, %c0_10] : memref<1x24x14xf32, #tpu.memory_space<vmem>>, vector<1x24x14xf32>
    %20 = vector.shape_cast %19 : vector<1x24x14xf32> to vector<24x14xf32>
    %21 = vector.shape_cast %17 : vector<24x14xf32> to vector<1x24x14xf32>
    tpu.vector_store %arg4[%18, %c0_9, %c0_10], %21 {strides = array<i32>} : memref<1x24x14xf32, #tpu.memory_space<vmem>>, vector<1x24x14xf32>,
    %c1_i32 = arith.constant 1 : i32
    return
  }
  func.func @transform_0(%arg0: i32) -> (i32, i32, i32) {
    %c0_i32 = arith.constant 0 : i32
    %c0_i32_0 = arith.constant 0 : i32
    %c0_i32_1 = arith.constant 0 : i32
    return %arg0, %c0_i32, %c0_i32_0 : i32, i32, i32
  }
  func.func @transform_1(%arg0: i32) -> (i32, i32) {
    %c0_i32 = arith.constant 0 : i32
    %c0_i32_0 = arith.constant 0 : i32
    %c0_i32_1 = arith.constant 0 : i32
    return %c0_i32, %c0_i32_0 : i32, i32
  }
  func.func @transform_2(%arg0: i32) -> (i32, i32) {
    %c0_i32 = arith.constant 0 : i32
    %c0_i32_0 = arith.constant 0 : i32
    %c0_i32_1 = arith.constant 0 : i32
    return %c0_i32, %c0_i32_0 : i32, i32
  }
  func.func @transform_3(%arg0: i32) -> (i32, i32, i32) {
    %c0_i32 = arith.constant 0 : i32
    %c0_i32_0 = arith.constant 0 : i32
    %c0_i32_1 = arith.constant 0 : i32
    return %arg0, %c0_i32, %c0_i32_0 : i32, i32, i32
  }
}

</mosaic_0001>

<bundles_post_ra>
// kernel: tpu_custom_call.1
= control target key start
LH: loop header
LB: loop body
LE: loop exit
PB: predicated region body
PF: predicated region fallthrough
CT: control target
= control target key end

     0   :  { %s665_s12 = smov 0   ;;  %s729_s0 = inlined_call_operand.vmem [shape: f32[2,4,16], index: 0, kind: input, shape index: {}]   ;;  %s730_s1 = inlined_call_operand.vmem [shape: f32[24,12], index: 1, kind: input, shape index: {}]   ;;  %s731_s2 = inlined_call_operand.vmem [shape: f32[24,1], index: 2, kind: input, shape index: {}]   ;;  %s732_s3 = inlined_call_operand.vmem [shape: f32[2,24,14], index: 3, kind: output, shape index: {}]  }
   0x1 LB: > { %s544_s13 = sadd.s32 4294967295, %s636_s12   ;;  %p548_p0 = scmp.ge.s32.totalorder %s636_s12, 1  ;;  %s636_s12 = sphi %s665_s12, %s13_s12  }
   0x2   : > { %p136_p1 = scmp.lt.s32.totalorder %s636_s12, 3 }
   0x4   : > { %p137_p2 = pnand %p548_p0, %p136_p1 }
   0x5   : > { %p159_p3 = scmp.lt.s32.totalorder (!%p137_p2), %s544_s13, 1  ;;  %s640_s18 = smov (!%p137_p2), 127  }
   0x6   : > { %140 = sbr.rel (%p137_p2) target bundleno = 340 (0x154), region = 32  ;;  %s641_s19 = smov (!%p137_p2), 126  }
   0x7   : > { %s642_s24 = smov (!%p137_p2), 124   ;;  %s643_s25 = smov (!%p137_p2), 120  }
   0xb   : > { %v638_v0 = vmov 0.0   ;;  %s734_s13 = smov (!%p159_p3, %s544_s13), 1  ;;  %vm639_vm0 = vmmov 0   ;;  %vm200_vm1 = vcmask 1043456   ;;  %vm190_vm2 = vcmask 31744   ;;  %v187_v2 = vld [vmem:[%s730_s1] sm:$0xff] }
   0xc   : > { %610 = vmatprep.subr.mxu1 %v638_v0  ;;  %577 = vmatprep.subr.mxu0 %v638_v0  ;;  %s549_s14 = sshll.u32 %s734_s13, 2  ;;  %v188_v3 = vld [vmem:[%s730_s1 + $0x8] sm:$0xff]  ;;  %v189_v4 = vld [vmem:[%s730_s1 + $0x10] sm:$0xff]  ;;  %v644_v5 = vmov 0   ;;  %v168_v7 = vld [vmem:[%s731_s2] sm:$0xff]  ;;  %s612_s7 = smul.u32 24, %s734_s13 }
   0xd   : > { %582 = vmatprep.mubr.msk.f32.mxu1 %vm639_vm0, %v638_v0  ;;  %579 = vmatprep.mubr.msk.f32.mxu0 %vm639_vm0, %v638_v0  ;;  %s162_s17 = scalar_lea.vmem %s729_s0, %s549_s14  ;;  %v169_v6 = vld [vmem:[%s731_s2 + $0x8] sm:$0xff]  ;;  %v170_v8 = vld [vmem:[%s731_s2 + $0x10] sm:$0xff]  ;;  %vm485_vm3 = vcmask 113664  }
   0xe   : > { %v171_v1 = vld [vmem:[%s162_s17] sm:$0xf]  ;;  %629 = vset.pattern.permute.xlu1 %v644_v5  ;;  %628 = vset.pattern.permute.xlu0 %v644_v5  ;;  %s167_s10 = scalar_lea.vmem %s732_s3, %s612_s7 }
   0xf   : > { %293 = vrot.lane.b32.xlu0 %v171_v1, %s640_s18  ;;  %392 = vrot.lane.b32.xlu1 %v171_v1, %s641_s19 }
  0x10   : > { %611 = vmatpush3.msk.msra.mxu1 %vm200_vm1, %v171_v1  ;;  %578 = vmatpush3.msk.msra.mxu0 %vm200_vm1, %v171_v1 }
  0x11   : > { %583 = vmatmul.mubr.msk.f32.vlgmr.msra.gmra.mxu1 %vm190_vm2, %v188_v3  ;;  %588 = vmatprep.subr.mxu1 %v638_v0 }
  0x12   : > { %585 = vmatprep.mubr.msk.f32.mxu1 %vm639_vm0, %v638_v0  ;;  %580 = vmatmul.mubr.msk.f32.vlgmr.msra.gmra.mxu0 %vm190_vm2, %v187_v2 }
  0x13   : > { %287 = vrot.lane.b32.xlu0 %v187_v2, %s642_s24  ;;  %386 = vrot.lane.b32.xlu1 %v187_v2, %s643_s25 }
  0x14   : > { %599 = vmatprep.subr.mxu0 %v638_v0  ;;  %601 = vmatprep.mubr.msk.f32.mxu0 %vm639_vm0, %v638_v0 }
  0x15   : > { %586 = vmatmul.mubr.msk.f32.gmra.mxu1 %vm190_vm2, %v189_v4 }
  0x16   : > { %590 = vmatprep.mubr.msk.f32.mxu1 %vm639_vm0, %v638_v0 }
  0x17   : > { %289 = vrot.lane.b32.xlu0 %v188_v3, %s642_s24  ;;  %388 = vrot.lane.b32.xlu1 %v188_v3, %s643_s25 }
  0x1b   : > { %291 = vrot.lane.b32.xlu0 %v189_v4, %s642_s24  ;;  %390 = vrot.lane.b32.xlu1 %v189_v4, %s643_s25 }
  0x1f   : > { %179 = vperm.xlu1 %629, %v169_v6   ;;  %174 = vperm.xlu0 %628, %v168_v7  }
  0x23   : > { %184 = vperm.xlu1 %629, %v170_v8  }
  0x81   : > { %v294_v9 = vpop.permute.xlu0 %293  ;;  %v393_v10 = vpop.permute.xlu1 %392 }
  0x82   : > { %589 = vmatpush3.msk.msra.mxu1 %vm200_vm1, %v294_v9  ;;  %600 = vmatpush3.msk.msra.mxu0 %vm200_vm1, %v393_v10 }
  0x85   : > { %v288_v11 = vpop.permute.xlu0 %287  ;;  %v387_v12 = vpop.permute.xlu1 %386 }
  0x86   : > { %591 = vmatmul.mubr.msk.f32.vlgmr.msra.gmra.mxu1 %vm190_vm2, %v288_v11  ;;  %602 = vmatmul.mubr.msk.f32.vlgmr.msra.gmra.mxu0 %vm190_vm2, %v387_v12 }
  0x87   : > { %593 = vmatprep.mubr.msk.f32.mxu1 %vm639_vm0, %v638_v0  ;;  %604 = vmatprep.mubr.msk.f32.mxu0 %vm639_vm0, %v638_v0 }
  0x89   : > { %v290_v13 = vpop.permute.xlu0 %289  ;;  %v389_v14 = vpop.permute.xlu1 %388 }
  0x8a   : > { %594 = vmatmul.mubr.msk.f32.gmra.mxu1 %vm190_vm2, %v290_v13  ;;  %605 = vmatmul.mubr.msk.f32.gmra.mxu0 %vm190_vm2, %v389_v14 }
  0x8b   : > { %596 = vmatprep.mubr.msk.f32.mxu1 %vm639_vm0, %v638_v0  ;;  %607 = vmatprep.mubr.msk.f32.mxu0 %vm639_vm0, %v638_v0 }
  0x8d   : > { %v292_v15 = vpop.permute.xlu0 %291  ;;  %v391_v16 = vpop.permute.xlu1 %390 }
  0x8e   : > { %597 = vmatmul.mubr.msk.f32.gmra.mxu1 %vm190_vm2, %v292_v15  ;;  %608 = vmatmul.mubr.msk.f32.gmra.mxu0 %vm190_vm2, %v391_v16 }
  0x9a   : > { %v175_v23 = vpop.permute.xlu0 %174  ;;  %v180_v24 = vpop.permute.xlu1 %179 }
  0x9e   : > { %v185_v32 = vpop.permute.xlu1 %184 }
  0xd1   : > { %v275_v17 = vpop.f32.mrf.mxu1 }
  0xd2   : > { %v270_v18 = vpop.f32.mrf.mxu0  ;;  %v285_v31 = vadd.f32 %v275_v17, %v180_v24 }
  0xd3   : > { %v584_v19 = vpop.f32.mrf.mxu1  ;;  %v284_v25 = vadd.f32 %v270_v18, %v175_v23 }
  0xd4   : > { %v581_v20 = vpop.f32.mrf.mxu0 }
  0xd5   : > { %v280_v21 = vpop.f32.mrf.mxu1 }
  0xd6   : > { %v286_v39 = vadd.f32 %v280_v21, %v185_v32 }
  0xd7   : > { %v587_v22 = vpop.f32.mrf.mxu1 }
 0x146   : > { %v369_v26 = vpop.f32.mrf.mxu1  ;;  %v468_v27 = vpop.f32.mrf.mxu0 }
 0x147   : > { %v383_v28 = vadd.f32 %v369_v26, %v284_v25 }
 0x148   : > { %v592_v29 = vpop.f32.mrf.mxu1  ;;  %v603_v30 = vpop.f32.mrf.mxu0 }
 0x149   : > { %v482_v33 = vadd.f32 %v468_v27, %v383_v28 }
 0x14a   : > { %v374_v34 = vpop.f32.mrf.mxu1  ;;  %v473_v35 = vpop.f32.mrf.mxu0 }
 0x14b   : > { %486 = vst.msk [vmem:[%s167_s10] sm:$0xff] %vm485_vm3, %v482_v33  ;;  %v384_v36 = vadd.f32 %v374_v34, %v285_v31 }
 0x14c   : > { %v595_v37 = vpop.f32.mrf.mxu1  ;;  %v606_v38 = vpop.f32.mrf.mxu0 }
 0x14d   : > { %v483_v40 = vadd.f32 %v473_v35, %v384_v36 }
 0x14e   : > { %v379_v41 = vpop.f32.mrf.mxu1  ;;  %v478_v42 = vpop.f32.mrf.mxu0 }
 0x14f   : > { %487 = vst.msk [vmem:[%s167_s10 + $0x8] sm:$0xff] %vm485_vm3, %v483_v40  ;;  %v385_v43 = vadd.f32 %v379_v41, %v286_v39 }
 0x150   : > { %v598_v44 = vpop.f32.mrf.mxu1  ;;  %v609_v45 = vpop.f32.mrf.mxu0 }
 0x151   : > { %v484_v46 = vadd.f32 %v478_v42, %v385_v43 }
 0x153   : > { %488 = vst.msk [vmem:[%s167_s10 + $0x10] sm:$0xff] %vm485_vm3, %v484_v46 }
 0x154 PF: > { %s13_s12 = sadd.s32 1, %s636_s12  }
 0x155   : > { %p10_p4 = scmp.ge.s32.totalorder %s13_s12, 4  }
 0x157   :  { %12 = sbr.rel (!%p10_p4) target bundleno = 1 (0x1), region = 62 }

</bundles_post_ra>
